<compile_context>
chip_gen: v5e
topology: v5e:2x2
jax: 0.10.0
libtpu: 0.0.40
codegen_flags: <defaults>
</compile_context>

<pallas_src>
import jax
import jax.numpy as jnp
import numpy as np
from jax.experimental import pallas as pl
from jax.experimental.pallas import tpu as pltpu

# ----------------------------- sizes -----------------------------------------
B = 2            # batch
C = 4            # image channels
H = W = 16       # image spatial
S = 8            # caption sequence length
VOCAB = 100      # stand-in vocab
HIDDEN = 32      # text_model_config.hidden_size (stand-in)
F_IMG = 64       # image_model.head.in_features (stand-in)
NUM_CLASSES = 1000       # timm classification head output -> 1000 + 512 = 1512
PROJ = 512
FC_IN = NUM_CLASSES + PROJ   # 1512
FC_OUT = 512
FIN_PAD = 128    # final 512->1 projection padded to 512->128 for lane-dense store


# ----------------------------- Pallas kernel ---------------------------------
def concat_head_kernel(img_ref, emb_ref, mask_ref,
                       w_if_ref, w_pool_ref,
                       w_img_fc_ref, w_txt_fc_ref,
                       w_fin_ref, bias_ref,
                       out_ref):
    f32 = jnp.float32

    # packed biases: one [4, 512] array, static slices
    b_fc   = bias_ref[0:1, :]              # [1, 512]  fused fc bias
    b_fin  = bias_ref[1:2, 0:FIN_PAD]      # [1, 128]  final-layer bias (padded)
    b_if   = bias_ref[2:3, 0:F_IMG]        # [1, 64]
    b_pool = bias_ref[3:4, 0:HIDDEN]       # [1, 32]

    # ---- image path (stand-in backbone: GAP + linear features) ----
    # TODO(synk): full timm pretrained conv/ViT backbone not reproduced; GAP+linear stand-in.
    img = img_ref[...]                                   # [B, C, H*W] lane-dense
    pooled = jnp.mean(img, axis=-1)                      # [B, C]  (lane reduce)
    feats = jnp.dot(pooled, w_if_ref[...],
                    preferred_element_type=f32) + b_if   # [B, F_IMG]
    # head(1000) and fc_out[:1000] folded offline into one 64x512 weight
    fc_img = jnp.dot(feats, w_img_fc_ref[...],
                     preferred_element_type=f32)         # [B, 512]

    # ---- text path (stand-in encoder: masked mean pooling; BERT-style tanh pooler) ----
    # TODO(synk): HuggingFace transformer encoder layers not reproduced; masked-mean stand-in.
    emb = emb_ref[...]                                   # [B, S, HIDDEN]
    mask = mask_ref[...]                                 # [B, S, 1]
    msum = jnp.sum(emb * mask, axis=1)                   # [B, HIDDEN]
    denom = jnp.maximum(jnp.sum(mask, axis=1), 1.0)      # [B, 1]
    pooler = jnp.tanh(jnp.dot(msum / denom, w_pool_ref[...],
                              preferred_element_type=f32) + b_pool)
    # text_model_out(512) and fc_out[1000:] folded offline into one 32x512 weight
    fc_txt = jnp.dot(pooler, w_txt_fc_ref[...],
                     preferred_element_type=f32)         # [B, 512]

    # ---- concat + fc + relu + final ----
    # concat([img_out, text_out]) @ W_fc + b_fc == fc_img + fc_txt + b_fc_fused (exact)
    fc = jnp.maximum(fc_img + fc_txt + b_fc, 0.0)        # ReLU, [B, 512]
    out_ref[...] = jnp.dot(fc, w_fin_ref[...],
                           preferred_element_type=f32) + b_fin   # [B, 128] (col 0 is real)


# ----------------------------- wrapper ----------------------------------------
def concat_model_forward(img_nchw, input_ids, attention_mask, fused):
    b, c, h, w = img_nchw.shape
    # NCHW -> [B, C, H*W]: pure contiguous reshape, no transpose.
    img3d = img_nchw.reshape(b, c, h * w).astype(jnp.float32)
    # glue: embedding lookup (gather) stays in plain JAX
    emb = jnp.take(fused["emb_table"], input_ids, axis=0).astype(jnp.float32)  # [B, S, HIDDEN]
    mask3d = attention_mask.astype(jnp.float32)[:, :, None]                    # [B, S, 1]

    ins = (img3d, emb, mask3d,
           fused["w_if"], fused["w_pool"],
           fused["w_img_fc"], fused["w_txt_fc"],
           fused["w_fin_pad"], fused["bias_pack"])

    vmem = lambda: pl.BlockSpec(memory_space=pltpu.MemorySpace.VMEM)
    out_pad = pl.pallas_call(
        concat_head_kernel,
        out_shape=jax.ShapeDtypeStruct((b, FIN_PAD), jnp.float32),
        in_specs=[vmem() for _ in ins],
        out_specs=vmem(),
    )(*ins)
    return out_pad[:, :1]                                  # [B, 1]


# ----------------------------- reference (plain JAX, unfused) -------------------
def reference_forward(img_nchw, input_ids, attention_mask, params):
    pooled = jnp.mean(img_nchw.astype(jnp.float32), axis=(2, 3))      # GAP -> [B, C]
    feats = pooled @ params["w_if"] + params["b_if"]
    img_out = feats @ params["w_head"] + params["b_head"]             # [B, 1000]

    emb = jnp.take(params["emb_table"], input_ids, axis=0).astype(jnp.float32)
    mask = attention_mask.astype(jnp.float32)
    msum = jnp.sum(emb * mask[:, :, None], axis=1)
    denom = jnp.maximum(jnp.sum(mask, axis=1, keepdims=True), 1.0)
    pooler = jnp.tanh((msum / denom) @ params["w_pool"] + params["b_pool"])
    text_out = pooler @ params["w_to"] + params["b_to"]               # [B, 512]

    concat = jnp.concatenate([img_out, text_out], axis=1)             # [B, 1512]
    fc = jnp.maximum(concat @ params["w_fc"] + params["b_fc"], 0.0)
    return fc @ params["w_fin"] + params["b_fin"]                     # [B, 1]


# ----------------------------- deterministic params ----------------------------
def init_params(key):
    ks = jax.random.split(key, 10)

    def lin(k, fan_in, fan_out):
        kw, kb = jax.random.split(k)
        scale = 1.0 / np.sqrt(fan_in)
        w = jax.random.normal(kw, (fan_in, fan_out), jnp.float32) * scale
        b_ = jax.random.normal(kb, (1, fan_out), jnp.float32) * scale
        return w, b_

    w_if, b_if = lin(ks[0], C, F_IMG)                 # stand-in image feature projection
    w_head, b_head = lin(ks[1], F_IMG, NUM_CLASSES)   # image_model.head -> 1000 classes
    w_pool, b_pool = lin(ks[2], HIDDEN, HIDDEN)       # BERT-style pooler dense
    w_to, b_to = lin(ks[3], HIDDEN, PROJ)             # text_model_out
    w_fc, b_fc = lin(ks[4], FC_IN, FC_OUT)            # fc_out (1512 -> 512)
    w_fin, b_fin = lin(ks[5], FC_OUT, 1)              # final_layer (512 -> 1)
    emb_table = jax.random.normal(ks[6], (VOCAB, HIDDEN), jnp.float32) * 0.02

    return dict(
        emb_table=emb_table,
        w_if=w_if, b_if=b_if,
        w_head=w_head, b_head=b_head,
        w_pool=w_pool, b_pool=b_pool,
        w_to=w_to, b_to=b_to,
        w_fc=w_fc, b_fc=b_fc,
        w_fin=w_fin, b_fin=b_fin,
    )


def fuse_params(p):
    """Offline (one-time) algebraic folding of bias-free linear chains + padding/packing."""
    w_fc_img = p["w_fc"][:NUM_CLASSES]                     # [1000, 512]
    w_fc_txt = p["w_fc"][NUM_CLASSES:]                     # [512, 512]

    w_img_fc = p["w_head"] @ w_fc_img                      # [64, 512]
    w_txt_fc = p["w_to"] @ w_fc_txt                        # [32, 512]
    b_fc_f = p["b_head"] @ w_fc_img + p["b_to"] @ w_fc_txt + p["b_fc"]   # [1, 512]

    # pad final 512->1 projection to 512->128 (only column 0 is meaningful)
    w_fin_pad = jnp.zeros((FC_OUT, FIN_PAD), jnp.float32).at[:, :1].set(p["w_fin"])

    # pack all bias vectors into one [4, 512] array (one DMA descriptor)
    bias_pack = jnp.zeros((4, FC_OUT), jnp.float32)
    bias_pack = bias_pack.at[0, :].set(b_fc_f[0])
    bias_pack = bias_pack.at[1, 0].set(p["b_fin"][0, 0])
    bias_pack = bias_pack.at[2, :F_IMG].set(p["b_if"][0])
    bias_pack = bias_pack.at[3, :HIDDEN].set(p["b_pool"][0])

    return dict(
        emb_table=p["emb_table"],
        w_if=p["w_if"], w_pool=p["w_pool"],
        w_img_fc=w_img_fc, w_txt_fc=w_txt_fc,
        w_fin_pad=w_fin_pad, bias_pack=bias_pack,
    )


# ----------------------------- main --------------------------------------------
if __name__ == "__main__":
    key = jax.random.PRNGKey(0)
    k_img, k_ids, k_param = jax.random.split(key, 3)

    img = jax.random.normal(k_img, (B, C, H, W), jnp.float32)            # NCHW like PyTorch
    caption_input_ids = jax.random.randint(k_ids, (B, S), 0, VOCAB, jnp.int32)
    caption_attention_mask = jnp.ones((B, S), jnp.int32).at[1, S - 2:].set(0)

    params = init_params(k_param)
    fused = fuse_params(params)            # computed once, not per call

    out = concat_model_forward(img, caption_input_ids, caption_attention_mask, fused)
    out = jax.block_until_ready(out)

    ref = jax.block_until_ready(
        reference_forward(img, caption_input_ids, caption_attention_mask, params))

    assert out.shape == (B, 1), out.shape
    np.testing.assert_allclose(np.asarray(out), np.asarray(ref), rtol=1e-4, atol=1e-4)
    print("KERNEL_OK")
</pallas_src>

<mosaic_0001>
module attributes {stable_mosaic.version = 11 : i64} {
  func.func @concat_head_kernel(%arg0: memref<2x4x256xf32, #tpu.memory_space<vmem>>, %arg1: memref<2x8x32xf32, #tpu.memory_space<vmem>>, %arg2: memref<2x8x1xf32, #tpu.memory_space<vmem>>, %arg3: memref<4x64xf32, #tpu.memory_space<vmem>>, %arg4: memref<32x32xf32, #tpu.memory_space<vmem>>, %arg5: memref<64x512xf32, #tpu.memory_space<vmem>>, %arg6: memref<32x512xf32, #tpu.memory_space<vmem>>, %arg7: memref<512x128xf32, #tpu.memory_space<vmem>>, %arg8: memref<4x512xf32, #tpu.memory_space<vmem>>, %arg9: memref<2x128xf32, #tpu.memory_space<vmem>>) attributes {dimension_semantics = [], scalar_prefetch = 0 : i64, scratch_operands = 0 : i64, tpu.core_type = #tpu.core_type<tc>} {
    %c0 = arith.constant 0 : index
    %c0_0 = arith.constant 0 : index
    %0 = vector.load %arg8[%c0, %c0_0] : memref<4x512xf32, #tpu.memory_space<vmem>>, vector<1x512xf32>
    %c1 = arith.constant 1 : index
    %c0_1 = arith.constant 0 : index
    %1 = vector.load %arg8[%c1, %c0_1] : memref<4x512xf32, #tpu.memory_space<vmem>>, vector<1x128xf32>
    %c2 = arith.constant 2 : index
    %c0_2 = arith.constant 0 : index
    %2 = vector.load %arg8[%c2, %c0_2] : memref<4x512xf32, #tpu.memory_space<vmem>>, vector<1x64xf32>
    %c3 = arith.constant 3 : index
    %c0_3 = arith.constant 0 : index
    %3 = vector.load %arg8[%c3, %c0_3] : memref<4x512xf32, #tpu.memory_space<vmem>>, vector<1x32xf32>
    %c0_4 = arith.constant 0 : index
    %c0_5 = arith.constant 0 : index
    %c0_6 = arith.constant 0 : index
    %4 = vector.load %arg0[%c0_4, %c0_5, %c0_6] : memref<2x4x256xf32, #tpu.memory_space<vmem>>, vector<2x4x256xf32>
    %cst = arith.constant dense<0.000000e+00> : vector<2x4xf32>
    %5 = vector.multi_reduction <add>, %4, %cst [2] : vector<2x4x256xf32> to vector<2x4xf32>
    %cst_7 = arith.constant 2.560000e+02 : f32
    %6 = vector.broadcast %cst_7 : f32 to vector<2x4xf32>
    %7 = arith.divf %5, %6 : vector<2x4xf32>
    %c0_8 = arith.constant 0 : index
    %c0_9 = arith.constant 0 : index
    %8 = vector.load %arg3[%c0_8, %c0_9] : memref<4x64xf32, #tpu.memory_space<vmem>>, vector<4x64xf32>
    %cst_10 = arith.constant dense<0.000000e+00> : vector<2x64xf32>
    %9 = tpu.matmul %7, %8, %cst_10 {dimension_numbers = #tpu.dot_dimension_numbers<[1], [0], [0], [1], [0, 0, 1, 1], [], []>} : vector<2x4xf32>, vector<4x64xf32>, vector<2x64xf32> -> vector<2x64xf32>
    %10 = vector.broadcast %2 : vector<1x64xf32> to vector<2x64xf32>
    %11 = arith.addf %9, %10 : vector<2x64xf32>
    %c0_11 = arith.constant 0 : index
    %c0_12 = arith.constant 0 : index
    %12 = vector.load %arg5[%c0_11, %c0_12] : memref<64x512xf32, #tpu.memory_space<vmem>>, vector<64x512xf32>
    %cst_13 = arith.constant dense<0.000000e+00> : vector<2x512xf32>
    %13 = tpu.matmul %11, %12, %cst_13 {dimension_numbers = #tpu.dot_dimension_numbers<[1], [0], [0], [1], [0, 0, 1, 1], [], []>} : vector<2x64xf32>, vector<64x512xf32>, vector<2x512xf32> -> vector<2x512xf32>
    %c0_14 = arith.constant 0 : index
    %c0_15 = arith.constant 0 : index
    %c0_16 = arith.constant 0 : index
    %14 = vector.load %arg1[%c0_14, %c0_15, %c0_16] : memref<2x8x32xf32, #tpu.memory_space<vmem>>, vector<2x8x32xf32>
    %c0_17 = arith.constant 0 : index
    %c0_18 = arith.constant 0 : index
    %c0_19 = arith.constant 0 : index
    %15 = vector.load %arg2[%c0_17, %c0_18, %c0_19] : memref<2x8x1xf32, #tpu.memory_space<vmem>>, vector<2x8x1xf32>
    %16 = vector.broadcast %15 : vector<2x8x1xf32> to vector<2x8x32xf32>
    %17 = arith.mulf %14, %16 : vector<2x8x32xf32>
    %cst_20 = arith.constant dense<0.000000e+00> : vector<2x32xf32>
    %18 = vector.multi_reduction <add>, %17, %cst_20 [1] : vector<2x8x32xf32> to vector<2x32xf32>
    %cst_21 = arith.constant dense<0.000000e+00> : vector<2x1xf32>
    %19 = vector.multi_reduction <add>, %15, %cst_21 [1] : vector<2x8x1xf32> to vector<2x1xf32>
    %cst_22 = arith.constant 1.000000e+00 : f32
    %20 = vector.broadcast %cst_22 : f32 to vector<2x1xf32>
    %21 = arith.maximumf %19, %20 : vector<2x1xf32>
    %22 = vector.broadcast %21 : vector<2x1xf32> to vector<2x32xf32>
    %23 = arith.divf %18, %22 : vector<2x32xf32>
    %c0_23 = arith.constant 0 : index
    %c0_24 = arith.constant 0 : index
    %24 = vector.load %arg4[%c0_23, %c0_24] : memref<32x32xf32, #tpu.memory_space<vmem>>, vector<32x32xf32>
    %cst_25 = arith.constant dense<0.000000e+00> : vector<2x32xf32>
    %25 = tpu.matmul %23, %24, %cst_25 {dimension_numbers = #tpu.dot_dimension_numbers<[1], [0], [0], [1], [0, 0, 1, 1], [], []>} : vector<2x32xf32>, vector<32x32xf32>, vector<2x32xf32> -> vector<2x32xf32>
    %26 = vector.broadcast %3 : vector<1x32xf32> to vector<2x32xf32>
    %27 = arith.addf %25, %26 : vector<2x32xf32>
    %28 = math.tanh %27 : vector<2x32xf32>
    %c0_26 = arith.constant 0 : index
    %c0_27 = arith.constant 0 : index
    %29 = vector.load %arg6[%c0_26, %c0_27] : memref<32x512xf32, #tpu.memory_space<vmem>>, vector<32x512xf32>
    %cst_28 = arith.constant dense<0.000000e+00> : vector<2x512xf32>
    %30 = tpu.matmul %28, %29, %cst_28 {dimension_numbers = #tpu.dot_dimension_numbers<[1], [0], [0], [1], [0, 0, 1, 1], [], []>} : vector<2x32xf32>, vector<32x512xf32>, vector<2x512xf32> -> vector<2x512xf32>
    %31 = arith.addf %13, %30 : vector<2x512xf32>
    %32 = vector.broadcast %0 : vector<1x512xf32> to vector<2x512xf32>
    %33 = arith.addf %31, %32 : vector<2x512xf32>
    %cst_29 = arith.constant 0.000000e+00 : f32
    %34 = vector.broadcast %cst_29 : f32 to vector<2x512xf32>
    %35 = arith.maximumf %33, %34 : vector<2x512xf32>
    %c0_30 = arith.constant 0 : index
    %c0_31 = arith.constant 0 : index
    %36 = vector.load %arg7[%c0_30, %c0_31] : memref<512x128xf32, #tpu.memory_space<vmem>>, vector<512x128xf32>
    %cst_32 = arith.constant dense<0.000000e+00> : vector<2x128xf32>
    %37 = tpu.matmul %35, %36, %cst_32 {dimension_numbers = #tpu.dot_dimension_numbers<[1], [0], [0], [1], [0, 0, 1, 1], [], []>} : vector<2x512xf32>, vector<512x128xf32>, vector<2x128xf32> -> vector<2x128xf32>
    %38 = vector.broadcast %1 : vector<1x128xf32> to vector<2x128xf32>
    %39 = arith.addf %37, %38 : vector<2x128xf32>
    %c0_33 = arith.constant 0 : index
    %c0_34 = arith.constant 0 : index
    %40 = vector.load %arg9[%c0_33, %c0_34] : memref<2x128xf32, #tpu.memory_space<vmem>>, vector<2x128xf32>
    tpu.vector_store %arg9[%c0_33, %c0_34], %39 {strides = array<i32>} : memref<2x128xf32, #tpu.memory_space<vmem>>, vector<2x128xf32>,
    return
  }
}

</mosaic_0001>

<bundles_post_ra>
// kernel: tpu_custom_call.1
= control target key start
LH: loop header
LB: loop body
LE: loop exit
PB: predicated region body
PF: predicated region fallthrough
CT: control target
= control target key end

     0   :  { %14 = vsyncpa [#allocation3], 0  ;;  %s1054_s0 = inlined_call_operand.vmem [shape: f32[2,4,256], index: 0, kind: input, shape index: {}]   ;;  %s1055_s1 = inlined_call_operand.hbm [shape: f32[2,8,32], index: 1, kind: input, shape index: {}]   ;;  %s1056_s2 = inlined_call_operand.vmem [shape: f32[2,8,1], index: 2, kind: input, shape index: {}]   ;;  %s1057_s3 = inlined_call_operand.vmem [shape: f32[4,64], index: 3, kind: input, shape index: {}]   ;;  %s1058_s4 = inlined_call_operand.hbm [shape: f32[32,32], index: 4, kind: input, shape index: {}]   ;;  %s1059_s5 = inlined_call_operand.hbm [shape: f32[64,512], index: 5, kind: input, shape index: {}]   ;;  %s1060_s6 = inlined_call_operand.hbm [shape: f32[32,512], index: 6, kind: input, shape index: {}]   ;;  %s1061_s7 = inlined_call_operand.hbm [shape: f32[512,128], index: 7, kind: input, shape index: {}]   ;;  %s1062_s8 = inlined_call_operand.hbm [shape: f32[4,512], index: 8, kind: input, shape index: {}]   ;;  %s1063_s9 = inlined_call_operand.hbm [shape: f32[2,128], index: 9, kind: output, shape index: {}]  }
   0x1   :  { %15 = vsyncpa [#allocation6], 0 }
   0x2   :  { %16 = vsyncpa [#allocation9], 0 }
   0x3   :  { %17 = vsyncpa [#allocation12], 0 }
   0x4   :  { %18 = vsyncpa [#allocation4], 0  ;;  %s42_s11 = sshll.u32 %s1058_s4, 4  ;;  %s932_s12 = smov [#allocation5]   ;;  %s43_s11 = int_to_ptr.hbm [resolvable:$true] %s42_s11 }
   0x5   :  { %s44_s13 = sshll.u32 %s932_s12, 4  ;;  %s933_s14 = smov 128   ;;  %s45_s13 = int_to_ptr.vmem [resolvable:$true] %s44_s13 }
   0x6   :  { %s934_s15 = smov 8   ;;  %s68_s18 = sshll.u32 %s1060_s6, 4  ;;  %s69_s18 = int_to_ptr.hbm [resolvable:$true] %s68_s18 }
   0x7   :  { %50 = dma.hbm_to_vmem [thread:$0]  %s43_s11, 512, %s45_s13, [#allocation6], %s933_s14, %s933_s14, %s934_s15  }
   0x8   :  { %s935_s19 = smov [#allocation8]   ;;  %s25_s4 = sshll.u32 %s1055_s1, 4  ;;  %s26_s4 = int_to_ptr.hbm [resolvable:$true] %s25_s4 }
   0x9   :  { %s70_s20 = sshll.u32 %s935_s19, 4  ;;  %s936_s23 = smov 512   ;;  %s71_s20 = int_to_ptr.vmem [resolvable:$true] %s70_s20 }
   0xa   :  { %s937_s24 = smov 32   ;;  %s55_s27 = sshll.u32 %s1059_s5, 4  ;;  %s56_s27 = int_to_ptr.hbm [resolvable:$true] %s55_s27 }
   0xb   :  { %76 = dma.hbm_to_vmem [thread:$0]  %s69_s18, 2048, %s71_s20, [#allocation9], %s936_s23, %s936_s23, %s937_s24  }
   0xc   :  { %s938_s28 = smov [#allocation2]   ;;  %s939_s6 = smov [#allocation7]  }
   0xd   :  { %s27_s29 = sshll.u32 %s938_s28, 4  ;;  %s57_s30 = sshll.u32 %s939_s6, 4  ;;  %s28_s29 = int_to_ptr.vmem [resolvable:$true] %s27_s29  ;;  %s58_s30 = int_to_ptr.vmem [resolvable:$true] %s57_s30 }
   0xe   :  { %33 = dma.hbm_to_vmem [thread:$0]  %s26_s4, 256, %s28_s29, [#allocation3], %s933_s14, %s933_s14, %s934_s15  }
   0xf   :  { %s81_s11 = sshll.u32 %s1061_s7, 4  ;;  %s95_s5 = sshll.u32 %s1062_s8, 4  ;;  %s82_s11 = int_to_ptr.hbm [resolvable:$true] %s81_s11  ;;  %s96_s5 = int_to_ptr.hbm [resolvable:$true] %s95_s5 }
  0x10   :  { %63 = dma.hbm_to_vmem [thread:$0]  %s56_s27, 4096, %s58_s30, [#allocation6], %s936_s23, %s936_s23, %s937_s24  }
  0x11   :  { %s940_s16 = smov [#allocation10]   ;;  %s941_s18 = smov [#allocation11]  }
  0x12   :  { %s83_s17 = sshll.u32 %s940_s16, 4  ;;  %s97_s19 = sshll.u32 %s941_s18, 4  ;;  %s84_s17 = int_to_ptr.vmem [resolvable:$true] %s83_s17  ;;  %s98_s19 = int_to_ptr.vmem [resolvable:$true] %s97_s19 }
  0x13   :  { %89 = dma.hbm_to_vmem [thread:$0]  %s82_s11, 8192, %s84_s17, [#allocation9], %s933_s14, %s933_s14, %s934_s15  }
  0x14   :  { %100 = dma.hbm_to_vmem [thread:$0]  %s96_s5, 256, %s98_s19, [#allocation12]  }
  0x15   :  { %922 = dma.done.wait [#allocation3], 256  }
  0x16   :  { %923 = vsyncadd [#allocation3], 4294967040 }
  0x17   :  { %924 = dma.done.wait [#allocation6], 4608  }
  0x18   :  { %925 = vsyncadd [#allocation6], 4294962688 }
  0x19   :  { %926 = dma.done.wait [#allocation9], 10240  }
  0x1a   :  { %927 = vsyncadd [#allocation9], 4294957056 }
  0x1b   :  { %928 = dma.done.wait [#allocation12], 256  }
  0x1c   :  { %929 = vsyncadd [#allocation12], 4294967040  ;;  %v942_v0 = vmov 0   ;;  %vm263_vm0 = vcmask 7168   ;;  %v234_v1 = vld [vmem:[%s1056_s2] sm:$0xff]  ;;  %v235_v2 = vld [vmem:[%s1056_s2 + $0x8] sm:$0xff]  ;;  %v168_v50 = vlaneseq }
  0x1d   :  { %742 = vset.pattern.permute.xlu1 %v942_v0  ;;  %741 = vset.pattern.permute.xlu0 %v942_v0  ;;  %v129_v3 = vld [vmem:[%s1054_s0] sm:$0xff]  ;;  %v264_v4 = vsel %vm263_vm0, %v234_v1, 0.0  ;;  %v271_v5 = vsel %vm263_vm0, %v235_v2, 0.0  ;;  %v130_v6 = vld [vmem:[%s1054_s0 + $0x8] sm:$0xff]  ;;  %vm144_vm1 = vcmask 1043456   ;;  %v943_v31 = vmov 256.0  }
  0x1e   :  { %238 = vperm.xlu1 %742, %v234_v1   ;;  %133 = vst [vmem:[#allocation1] ss:$2 sm:$0xff] %v129_v3  ;;  %v265_v7 = vrot.slane %v264_v4, 4  ;;  %v272_v8 = vrot.slane %v271_v5, 4  ;;  %746 = vrcp.f32 %v943_v31  ;;  %v323_v34 = vld [vmem:[#allocation5 + $0x18] sm:$0xff]  ;;  %v322_v36 = vld [vmem:[#allocation5 + $0x10] sm:$0xff] }
  0x1f   :  { %137 = vst [vmem:[#allocation1 + $0x10] ss:$2 sm:$0xff] %v130_v6  ;;  %342 = vmatpush.msra.mxu1 %v323_v34  ;;  %v321_v37 = vld [vmem:[#allocation5 + $0x8] sm:$0xff]  ;;  %v232_v38 = vld [vmem:[#allocation2] sm:$0xff]  ;;  %v233_v40 = vld [vmem:[#allocation2 + $0x8] sm:$0xff]  ;;  %vm248_vm3 = vcmask 261120  }
  0x20   :  { %v266_v9 = vadd.f32 %v265_v7, %v264_v4  ;;  %v273_v10 = vadd.f32 %v272_v8, %v271_v5  ;;  %v320_v42 = vld [vmem:[#allocation5] sm:$0xff]  ;;  %v164_v48 = vld [vmem:[%s1057_s3] sm:$0xf]  ;;  %v365_v52 = vld [vmem:[#allocation8 + $0x70] sm:$0xff]  ;;  %v169_v62 = vand.u32 127, %v168_v50  ;;  %vm174_vm4 = vcmask 31744  }
  0x21   :  { %343 = vmatpush.msra.mxu1 %v322_v36  ;;  %v363_v49 = vld [vmem:[#allocation8 + $0x60] sm:$0xff]  ;;  %717 = vmatpush.msk.msra.mxu0 %vm144_vm1, %v164_v48  ;;  %v364_v51 = vld [vmem:[#allocation8 + $0x68] sm:$0xff]  ;;  %v366_v53 = vld [vmem:[#allocation8 + $0x78] sm:$0xff]  ;;  %vm172_vm5 = vcmask 1041409   ;;  %vm450_vm14 = vcmask 523264   ;;  %s944_s3 = smov [#allocation13]  }
  0x22   :  { %v267_v11 = vrot.slane %v266_v9, 2  ;;  %v274_v12 = vrot.slane %v273_v10, 2  ;;  %382 = vmatpush.msra.mxu2 %v363_v49  ;;  %402 = vmatpush.msra.mxu3 %v364_v51  ;;  %v359_v55 = vld [vmem:[#allocation8 + $0x40] sm:$0xff]  ;;  %v360_v56 = vld [vmem:[#allocation8 + $0x48] sm:$0xff]  ;;  %v361_v57 = vld [vmem:[#allocation8 + $0x50] sm:$0xff]  ;;  %s702_s23 = sshll.u32 %s944_s3, 4  ;;  %s703_s23 = int_to_ptr.vmem [resolvable:$true] %s702_s23 }
  0x23   :  { %344 = vmatpush.msra.mxu1 %v321_v37  ;;  %422 = vmatpush.msrb.mxu0 %v365_v52  ;;  %v362_v61 = vld [vmem:[#allocation8 + $0x58] sm:$0xff]  ;;  %v228_v49 = vld [vmem:[#allocation7 + $0xe0] sm:$0xff]  ;;  %v229_v50 = vld [vmem:[#allocation7 + $0xe8] sm:$0xff]  ;;  %s704_s26 = sshll.u32 %s1063_s9, 4  ;;  %s705_s26 = int_to_ptr.hbm [resolvable:$true] %s704_s26 }
  0x24   :  { %v275_v13 = vadd.f32 %v274_v12, %v273_v10  ;;  %v268_v14 = vadd.f32 %v267_v11, %v266_v9  ;;  %v747_v33 = vpop.eup %746  ;;  %383 = vmatpush.msra.mxu2 %v359_v55  ;;  %403 = vmatpush.msra.mxu3 %v360_v56  ;;  %v354_v48 = vld [vmem:[#allocation8 + $0x18] sm:$0xff]  ;;  %v230_v51 = vld [vmem:[#allocation7 + $0xf0] sm:$0xff] }
  0x25   :  { %v134_v15 = vld.sshfl [vmem:[#allocation1] sm:$0xff pattern:$0x75316420]  ;;  %v135_v16 = vld.sshfl [vmem:[#allocation1 + $0x8] sm:$0xff pattern:$0x75316420]  ;;  %vm160_vm2 = vweird.f32 %v747_v33  ;;  %345 = vmatpush.msra.mxu1 %v320_v42  ;;  %423 = vmatpush.msrb.mxu0 %v361_v57 }
  0x26   :  { %243 = vperm.xlu1 %742, %v235_v2   ;;  %v145_v17 = vsel %vm144_vm1, %v134_v15, 0.0  ;;  %v146_v18 = vsel %vm144_vm1, %v135_v16, 0.0  ;;  %v138_v19 = vld.sshfl [vmem:[#allocation1 + $0x10] sm:$0xff pattern:$0x75316420]  ;;  %v269_v20 = vrot.slane %v268_v14, 1 }
  0x27   :  { %v147_v21 = vadd.f32 %v146_v18, %v145_v17  ;;  %v139_v22 = vld.sshfl [vmem:[#allocation1 + $0x18] sm:$0xff pattern:$0x75316420]  ;;  %v276_v24 = vrot.slane %v275_v13, 1  ;;  %v150_v25 = vsel %vm144_vm1, %v138_v19, 0.0  ;;  %v156_v35 = vmul.f32 256.0, %v747_v33  ;;  %442 = vmatpush.msrb.mxu1 %v366_v53 }
  0x28   :  { %v270_v23 = vadd.f32 %v269_v20, %v268_v14  ;;  %v151_v26 = vsel %vm144_vm1, %v139_v22, 0.0  ;;  %v356_v42 = vld [vmem:[#allocation8 + $0x28] sm:$0xff]  ;;  %v231_v52 = vld [vmem:[#allocation7 + $0xf8] sm:$0xff]  ;;  %v224_v53 = vld [vmem:[#allocation7 + $0xc0] sm:$0xff] }
  0x29   :  { %148 = vadd.xlane.f32.xlu2 %v147_v21  ;;  %v277_v28 = vadd.f32 %v276_v24, %v275_v13  ;;  %v152_v29 = vadd.f32 %v151_v26, %v150_v25  ;;  %v157_v41 = vsub.f32 1.0, %v156_v35  ;;  %443 = vmatpush.msrb.mxu1 %v362_v61  ;;  %v226_v55 = vld [vmem:[#allocation7 + $0xd0] sm:$0xff]  ;;  %v227_v56 = vld [vmem:[#allocation7 + $0xd8] sm:$0xff]  ;;  %v220_v57 = vld [vmem:[#allocation7 + $0xa0] sm:$0xff] }
  0x2a   :  { %v278_v27 = vmax.f32 %v270_v23, 1.0  ;;  %404 = vmatpush.msra.mxu3 %v356_v42  ;;  %v216_v61 = vld [vmem:[#allocation7 + $0x80] sm:$0xff]  ;;  %v562_v42 = vld [vmem:[#allocation10 + $0x58] sm:$0xff] }
  0x2b   :  { %v279_v30 = vmax.f32 %v277_v28, 1.0  ;;  %v158_v43 = vmul.f32 %v747_v33, %v157_v41  ;;  %v355_v41 = vld [vmem:[#allocation8 + $0x20] sm:$0xff] }
  0x2c   :  { %282 = vperm.xlu0 %741, %v278_v27   ;;  %384 = vmatpush.msra.mxu2 %v355_v41  ;;  %v610_v41 = vld [vmem:[#allocation10 + $0x1d8] sm:$0xff] }
  0x2d   :  { %v159_v46 = vadd.f32 %v747_v33, %v158_v43  ;;  %v357_v43 = vld [vmem:[#allocation8 + $0x30] sm:$0xff] }
  0x2e   :  { %424 = vmatpush.msrb.mxu0 %v357_v43  ;;  %v578_v43 = vld [vmem:[#allocation10 + $0xd8] sm:$0xff] }
  0x2f   :  { %v161_v54 = vsel %vm160_vm2, %v747_v33, %v159_v46  ;;  %v352_v46 = vld [vmem:[#allocation8 + $0x8] sm:$0xff] }
  0x30   :  { %405 = vmatpush.msra.mxu3 %v352_v46  ;;  %v592_v46 = vld [vmem:[#allocation10 + $0x148] sm:$0xff] }
  0x31   :  { %153 = vadd.xlane.f32.xlu2 %v152_v29 }
  0x32   :  { %482 = vmatpush.msrb.mxu3 %v229_v50  ;;  %v561_v50 = vld [vmem:[#allocation10 + $0x50] sm:$0xff] }
  0x34   :  { %287 = vperm.xlu0 %741, %v279_v30  }
  0x90   :  { %v239_v32 = vpop.permute.xlu1 %238 }
  0x91   :  { %v246_v44 = vmul.f32 %v239_v32, %v232_v38 }
  0x93   :  { %v249_v58 = vsel %vm248_vm3, %v246_v44, 0.0  ;;  %v358_v44 = vld [vmem:[#allocation8 + $0x38] sm:$0xff] }
  0x94   :  { %v250_v0 = vrot.slane %v249_v58, 4  ;;  %444 = vmatpush.msrb.mxu1 %v358_v44  ;;  %v593_v44 = vld [vmem:[#allocation10 + $0x150] sm:$0xff] }
  0x96   :  { %v251_v6 = vadd.f32 %v250_v0, %v249_v58  ;;  %445 = vmatpush.msrb.mxu1 %v354_v48  ;;  %v221_v58 = vld [vmem:[#allocation7 + $0xa8] sm:$0xff]  ;;  %v219_v0 = vld [vmem:[#allocation7 + $0x98] sm:$0xff]  ;;  %v591_v48 = vld [vmem:[#allocation10 + $0x140] sm:$0xff] }
  0x98   :  { %v244_v39 = vpop.permute.xlu1 %243  ;;  %v252_v13 = vrot.slane %v251_v6, 2 }
  0x99   :  { %v247_v45 = vmul.f32 %v244_v39, %v233_v40 }
  0x9a   :  { %v253_v17 = vadd.f32 %v252_v13, %v251_v6  ;;  %v209_v6 = vld [vmem:[#allocation7 + $0x48] sm:$0xff]  ;;  %v200_v13 = vld [vmem:[#allocation7] sm:$0xff] }
  0x9b   :  { %v256_v59 = vsel %vm248_vm3, %v247_v45, 0.0  ;;  %v351_v45 = vld [vmem:[#allocation8] sm:$0xff] }
  0x9c   :  { %v149_v47 = vpop.xlane.xlu2 %148  ;;  %v257_v1 = vrot.slane %v256_v59, 4  ;;  %v254_v24 = vrot.slane %v253_v17, 1  ;;  %385 = vmatpush.msra.mxu2 %v351_v45  ;;  %v609_v45 = vld [vmem:[#allocation10 + $0x1d0] sm:$0xff] }
  0x9d   :  { %v162_v63 = vmul.f32 %v161_v54, %v149_v47  ;;  %v353_v47 = vld [vmem:[#allocation8 + $0x10] sm:$0xff] }
  0x9e   :  { %v283_v60 = vpop.permute.xlu0 %282  ;;  %v258_v7 = vadd.f32 %v257_v1, %v256_v59  ;;  %v255_v34 = vadd.f32 %v254_v24, %v253_v17  ;;  %425 = vmatpush.msrb.mxu0 %v353_v47  ;;  %462 = vmatpush.msrb.mxu2 %v228_v49  ;;  %v222_v59 = vld [vmem:[#allocation7 + $0xb0] sm:$0xff]  ;;  %v212_v1 = vld [vmem:[#allocation7 + $0x60] sm:$0xff]  ;;  %v582_v24 = vld [vmem:[#allocation10 + $0xf8] sm:$0xff] }
  0x9f   :  { %748 = vrcp.f32 %v283_v60  ;;  %v170_v3 = vperm.slane %v162_v63, %v169_v62  ;;  %v301_v21 = vand.u32 2147483648, %v283_v60  ;;  %vm295_vm7 = vweird.f32 %v283_v60  ;;  %v218_v63 = vld [vmem:[#allocation7 + $0x90] sm:$0xff]  ;;  %v743_v17 = vld [vmem:[#allocation11 + $0x3] ss:$0 sm:$0xff]  ;;  %v608_v47 = vld [vmem:[#allocation10 + $0x1c8] sm:$0xff] }
  0xa0   :  { %v259_v14 = vrot.slane %v258_v7, 2  ;;  %v299_v22 = vand.u32 2147483647, %v283_v60  ;;  %463 = vmatpush.msrb.mxu2 %v224_v53  ;;  %v607_v49 = vld [vmem:[#allocation10 + $0x1c0] sm:$0xff]  ;;  %v606_v53 = vld [vmem:[#allocation10 + $0x1b8] sm:$0xff] }
  0xa1   :  { %v302_v30 = vor.u32 1.1754944e-38, %v301_v21  ;;  %v598_v21 = vld [vmem:[#allocation10 + $0x178] sm:$0xff] }
  0xa2   :  { %v260_v18 = vadd.f32 %v259_v14, %v258_v7  ;;  %vm300_vm10 = vcmp.eq.f32.partialorder %v299_v22, 8.507059e+37  ;;  %464 = vmatpush.msrb.mxu2 %v220_v57  ;;  %v210_v7 = vld [vmem:[#allocation7 + $0x50] sm:$0xff]  ;;  %v201_v14 = vld [vmem:[#allocation7 + $0x8] sm:$0xff]  ;;  %v614_v22 = vld [vmem:[#allocation10 + $0x1f8] sm:$0xff] }
  0xa3   :  { %v605_v57 = vld [vmem:[#allocation10 + $0x1b0] sm:$0xff] }
  0xa4   :  { %v154_v2 = vpop.xlane.xlu2 %153  ;;  %v261_v25 = vrot.slane %v260_v18, 1  ;;  %465 = vmatpush.msrb.mxu2 %v216_v61  ;;  %v604_v61 = vld [vmem:[#allocation10 + $0x1a8] sm:$0xff] }
  0xa5   :  { %v163_v4 = vmul.f32 %v161_v54, %v154_v2  ;;  %v749_v5 = vpop.eup %748  ;;  %v225_v54 = vld [vmem:[#allocation7 + $0xc8] sm:$0xff] }
  0xa6   :  { %v291_v8 = vmul.f32 %v749_v5, %v283_v60  ;;  %v288_v9 = vpop.permute.xlu0 %287  ;;  %vm296_vm6 = vweird.f32 %v749_v5  ;;  %v262_v35 = vadd.f32 %v261_v25, %v260_v18  ;;  %483 = vmatpush.msrb.mxu3 %v225_v54  ;;  %v223_v60 = vld [vmem:[#allocation7 + $0xb8] sm:$0xff]  ;;  %v213_v2 = vld [vmem:[#allocation7 + $0x68] sm:$0xff]  ;;  %466 = vmatpush.msrb.mxu2 %v212_v1  ;;  %v597_v25 = vld [vmem:[#allocation10 + $0x170] sm:$0xff] }
  0xa7   :  { %v171_v10 = vperm.slane %v163_v4, %v169_v62  ;;  %750 = vrcp.f32 %v288_v9  ;;  %vm297_vm8 = vmor %vm295_vm7, %vm296_vm6  ;;  %v316_v26 = vand.u32 2147483648, %v288_v9  ;;  %v314_v28 = vand.u32 2147483647, %v288_v9  ;;  %v217_v62 = vld [vmem:[#allocation7 + $0x88] sm:$0xff]  ;;  %v215_v4 = vld [vmem:[#allocation7 + $0x78] sm:$0xff] }
  0xa8   :  { %v292_v11 = vsub.f32 1.0, %v291_v8  ;;  %vm310_vm11 = vweird.f32 %v288_v9  ;;  %484 = vmatpush.msrb.mxu3 %v221_v58  ;;  %v211_v8 = vld [vmem:[#allocation7 + $0x58] sm:$0xff]  ;;  %v560_v54 = vld [vmem:[#allocation10 + $0x48] sm:$0xff]  ;;  %v559_v58 = vld [vmem:[#allocation10 + $0x40] sm:$0xff] }
  0xa9   :  { %v173_v12 = vsel %vm172_vm5, %v171_v10, %v170_v3  ;;  %v317_v32 = vor.u32 1.1754944e-38, %v316_v26  ;;  %vm315_vm13 = vcmp.eq.f32.partialorder %v314_v28, 8.507059e+37  ;;  %v214_v3 = vld [vmem:[#allocation7 + $0x70] sm:$0xff]  ;;  %v205_v10 = vld [vmem:[#allocation7 + $0x28] sm:$0xff]  ;;  %v603_v1 = vld [vmem:[#allocation10 + $0x1a0] sm:$0xff] }
  0xaa   :  { %718 = vmatmul.msk.f32.vlgmr.msra.gmra.mxu0 %vm174_vm4, %v173_v12  ;;  %v293_v15 = vmul.f32 %v749_v5, %v292_v11  ;;  %485 = vmatpush.msrb.mxu3 %v217_v62  ;;  %v206_v11 = vld [vmem:[#allocation7 + $0x30] sm:$0xff]  ;;  %v207_v12 = vld [vmem:[#allocation7 + $0x38] sm:$0xff] }
  0xab   :  { %502 = vmatpush.msra.mxu0 %v230_v51  ;;  %v613_v26 = vld [vmem:[#allocation10 + $0x1f0] sm:$0xff]  ;;  %v558_v62 = vld [vmem:[#allocation10 + $0x38] sm:$0xff] }
  0xac   :  { %v294_v19 = vadd.f32 %v749_v5, %v293_v15  ;;  %486 = vmatpush.msrb.mxu3 %v213_v2  ;;  %v202_v15 = vld [vmem:[#allocation7 + $0x10] sm:$0xff] }
  0xad   :  { %v751_v16 = vpop.eup %750  ;;  %503 = vmatpush.msra.mxu0 %v226_v55  ;;  %v565_v28 = vld [vmem:[#allocation10 + $0x70] sm:$0xff]  ;;  %v576_v55 = vld [vmem:[#allocation10 + $0xc8] sm:$0xff] }
  0xae   :  { %v306_v20 = vmul.f32 %v751_v16, %v288_v9  ;;  %vm311_vm9 = vweird.f32 %v751_v16  ;;  %v298_v29 = vsel %vm297_vm8, %v749_v5, %v294_v19  ;;  %v208_v5 = vld [vmem:[#allocation7 + $0x40] sm:$0xff]  ;;  %487 = vmatpush.msrb.mxu3 %v209_v6  ;;  %v577_v51 = vld [vmem:[#allocation10 + $0xd0] sm:$0xff]  ;;  %v556_v6 = vld [vmem:[#allocation10 + $0x28] sm:$0xff] }
  0xaf   :  { %vm312_vm12 = vmor %vm310_vm11, %vm311_vm9  ;;  %v303_v33 = vsel %vm300_vm10, %v302_v30, %v298_v29  ;;  %504 = vmatpush.msra.mxu0 %v222_v59  ;;  %v204_v9 = vld [vmem:[#allocation7 + $0x20] sm:$0xff]  ;;  %467 = vmatpush.msrb.mxu2 %v208_v5  ;;  %v581_v29 = vld [vmem:[#allocation10 + $0xf0] sm:$0xff] }
  0xb0   :  { %v307_v23 = vsub.f32 1.0, %v306_v20  ;;  %v304_v38 = vmul.f32 %v303_v33, %v255_v34  ;;  %488 = vmatpush.msrb.mxu3 %v205_v10  ;;  %v564_v33 = vld [vmem:[#allocation10 + $0x68] sm:$0xff]  ;;  %v575_v59 = vld [vmem:[#allocation10 + $0xc0] sm:$0xff]  ;;  %v557_v2 = vld [vmem:[#allocation10 + $0x30] sm:$0xff] }
  0xb1   :  { %505 = vmatpush.msra.mxu0 %v218_v63  ;;  %468 = vmatpush.msrb.mxu2 %v204_v9  ;;  %v580_v34 = vld [vmem:[#allocation10 + $0xe8] sm:$0xff]  ;;  %v574_v63 = vld [vmem:[#allocation10 + $0xb8] sm:$0xff]  ;;  %v601_v9 = vld [vmem:[#allocation10 + $0x190] sm:$0xff] }
  0xb2   :  { %v308_v27 = vmul.f32 %v751_v16, %v307_v23  ;;  %489 = vmatpush.msrb.mxu3 %v201_v14  ;;  %v566_v23 = vld [vmem:[#allocation10 + $0x78] sm:$0xff]  ;;  %v555_v10 = vld [vmem:[#allocation10 + $0x20] sm:$0xff] }
  0xb3   :  { %506 = vmatpush.msra.mxu0 %v214_v3  ;;  %469 = vmatpush.msrb.mxu2 %v200_v13  ;;  %v573_v3 = vld [vmem:[#allocation10 + $0xb0] sm:$0xff]  ;;  %v602_v5 = vld [vmem:[#allocation10 + $0x198] sm:$0xff]  ;;  %v600_v13 = vld [vmem:[#allocation10 + $0x188] sm:$0xff] }
  0xb4   :  { %v309_v31 = vadd.f32 %v751_v16, %v308_v27  ;;  %v744_v27 = vld [vmem:[#allocation11 + $0x2] ss:$0 sm:$0xff]  ;;  %v554_v14 = vld [vmem:[#allocation10 + $0x18] sm:$0xff] }
  0xb5   :  { %507 = vmatpush.msra.mxu0 %v210_v7  ;;  %v572_v7 = vld [vmem:[#allocation10 + $0xa8] sm:$0xff] }
  0xb6   :  { %v313_v36 = vsel %vm312_vm12, %v751_v16, %v309_v31  ;;  %v203_v16 = vld [vmem:[#allocation7 + $0x18] sm:$0xff]  ;;  %v596_v31 = vld [vmem:[#allocation10 + $0x168] sm:$0xff] }
  0xb7   :  { %v318_v37 = vsel %vm315_vm13, %v317_v32, %v313_v36  ;;  %508 = vmatpush.msra.mxu0 %v206_v11  ;;  %v612_v32 = vld [vmem:[#allocation10 + $0x1e8] sm:$0xff]  ;;  %v595_v36 = vld [vmem:[#allocation10 + $0x160] sm:$0xff] }
  0xb8   :  { %v319_v39 = vmul.f32 %v318_v37, %v262_v35  ;;  %v611_v37 = vld [vmem:[#allocation10 + $0x1e0] sm:$0xff] }
  0xb9   :  { %509 = vmatpush.msra.mxu0 %v202_v15  ;;  %v571_v11 = vld [vmem:[#allocation10 + $0xa0] sm:$0xff]  ;;  %v570_v15 = vld [vmem:[#allocation10 + $0x98] sm:$0xff] }
  0xba   :  { %v327_v40 = vsel %vm172_vm5, %v319_v39, %v304_v38  ;;  %v563_v38 = vld [vmem:[#allocation10 + $0x60] sm:$0xff] }
  0xbb   :  { %719 = vmatmul.msk.f32.vlgmr.msra.gmra.mxu1 %vm248_vm3, %v327_v40  ;;  %v579_v39 = vld [vmem:[#allocation10 + $0xe0] sm:$0xff]  ;;  %v594_v40 = vld [vmem:[#allocation10 + $0x158] sm:$0xff] }
  0xbc   :  { %522 = vmatpush.msra.mxu1 %v231_v52  ;;  %v590_v52 = vld [vmem:[#allocation10 + $0x138] sm:$0xff] }
  0xbe   :  { %523 = vmatpush.msra.mxu1 %v227_v56  ;;  %v589_v56 = vld [vmem:[#allocation10 + $0x130] sm:$0xff] }
  0xc0   :  { %524 = vmatpush.msra.mxu1 %v223_v60  ;;  %v588_v60 = vld [vmem:[#allocation10 + $0x128] sm:$0xff] }
  0xc2   :  { %525 = vmatpush.msra.mxu1 %v219_v0  ;;  %v587_v0 = vld [vmem:[#allocation10 + $0x120] sm:$0xff] }
  0xc4   :  { %526 = vmatpush.msra.mxu1 %v215_v4  ;;  %v586_v4 = vld [vmem:[#allocation10 + $0x118] sm:$0xff] }
  0xc6   :  { %527 = vmatpush.msra.mxu1 %v211_v8  ;;  %v585_v8 = vld [vmem:[#allocation10 + $0x110] sm:$0xff] }
  0xc8   :  { %528 = vmatpush.msra.mxu1 %v207_v12  ;;  %v584_v12 = vld [vmem:[#allocation10 + $0x108] sm:$0xff] }
  0xca   :  { %529 = vmatpush.msra.mxu1 %v203_v16  ;;  %v583_v16 = vld [vmem:[#allocation10 + $0x100] sm:$0xff] }
 0x127   :  { %v197_v30 = vpop.f32.mrf.mxu0 }
 0x128   :  { %v198_v35 = vadd.f32 %v744_v27, %v197_v30 }
 0x138   :  { %v347_v18 = vpop.f32.mrf.mxu1 }
 0x139   :  { %v348_v19 = vadd.f32 %v743_v17, %v347_v18  ;;  %v599_v17 = vld [vmem:[#allocation10 + $0x180] sm:$0xff]  ;;  %v553_v18 = vld [vmem:[#allocation10 + $0x10] sm:$0xff] }
 0x13b   :  { %752 = vtanh.f32 %v348_v19  ;;  %v569_v19 = vld [vmem:[#allocation10 + $0x90] sm:$0xff] }
 0x141   :  { %v753_v20 = vpop.eup %752 }
 0x142   :  { %720 = vmatmul.msk.f32.vlgmr.msra.gmra.mxu2 %vm248_vm3, %v753_v20  ;;  %721 = vmatmul.msk.f32.vlgmr.msra.gmra.mxu3 %vm248_vm3, %v753_v20 }
 0x143   :  { %722 = vmatmul.msk.f32.vlgmr.msrb.gmra.mxu0 %vm248_vm3, %v753_v20  ;;  %723 = vmatmul.msk.f32.vlgmr.msrb.gmra.mxu1 %vm248_vm3, %v753_v20  ;;  %v552_v20 = vld [vmem:[#allocation10 + $0x8] sm:$0xff] }
 0x144   :  { %656 = vmatpush.msrb.mxu0 %v598_v21  ;;  %676 = vmatpush.msrb.mxu1 %v614_v22  ;;  %v568_v21 = vld [vmem:[#allocation10 + $0x88] sm:$0xff]  ;;  %v551_v22 = vld [vmem:[#allocation10] sm:$0xff] }
 0x145   :  { %616 = vmatpush.msra.mxu2 %v566_v23  ;;  %636 = vmatpush.msra.mxu3 %v582_v24  ;;  %v567_v23 = vld [vmem:[#allocation10 + $0x80] sm:$0xff] }
 0x146   :  { %657 = vmatpush.msrb.mxu0 %v597_v25  ;;  %677 = vmatpush.msrb.mxu1 %v613_v26  ;;  %v125_v26 = vld [vmem:[#allocation11] ss:$4 sm:$0xf] }
 0x147   :  { %617 = vmatpush.msra.mxu2 %v565_v28  ;;  %637 = vmatpush.msra.mxu3 %v581_v29  ;;  %v537_v29 = vperm.slane %v125_v26, 2  ;;  %v538_v30 = vperm.slane %v125_v26, 3 }
 0x148   :  { %658 = vmatpush.msrb.mxu0 %v596_v31  ;;  %678 = vmatpush.msrb.mxu1 %v612_v32 }
 0x149   :  { %618 = vmatpush.msra.mxu2 %v564_v33  ;;  %638 = vmatpush.msra.mxu3 %v580_v34 }
 0x14a   :  { %724 = vmatmul.msk.f32.vlgmr.msrb.gmra.mxu2 %vm450_vm14, %v198_v35  ;;  %725 = vmatmul.msk.f32.vlgmr.msrb.gmra.mxu3 %vm450_vm14, %v198_v35 }
 0x14b   :  { %726 = vmatmul.msk.f32.vlgmr.msra.gmra.mxu0 %vm450_vm14, %v198_v35  ;;  %727 = vmatmul.msk.f32.vlgmr.msra.gmra.mxu1 %vm450_vm14, %v198_v35 }
 0x14c   :  { %659 = vmatpush.msrb.mxu0 %v595_v36  ;;  %679 = vmatpush.msrb.mxu1 %v611_v37  ;;  %v535_v37 = vperm.slane %v125_v26, 0 }
 0x14d   :  { %619 = vmatpush.msra.mxu2 %v563_v38  ;;  %639 = vmatpush.msra.mxu3 %v579_v39  ;;  %v536_v38 = vperm.slane %v125_v26, 1 }
 0x14e   :  { %660 = vmatpush.msrb.mxu0 %v594_v40  ;;  %680 = vmatpush.msrb.mxu1 %v610_v41 }
 0x14f   :  { %620 = vmatpush.msra.mxu2 %v562_v42  ;;  %640 = vmatpush.msra.mxu3 %v578_v43 }
 0x150   :  { %661 = vmatpush.msrb.mxu0 %v593_v44  ;;  %681 = vmatpush.msrb.mxu1 %v609_v45 }
 0x151   :  { %621 = vmatpush.msra.mxu2 %v561_v50  ;;  %641 = vmatpush.msra.mxu3 %v577_v51 }
 0x152   :  { %662 = vmatpush.msrb.mxu0 %v592_v46  ;;  %682 = vmatpush.msrb.mxu1 %v608_v47 }
 0x153   :  { %622 = vmatpush.msra.mxu2 %v560_v54  ;;  %642 = vmatpush.msra.mxu3 %v576_v55 }
 0x154   :  { %663 = vmatpush.msrb.mxu0 %v591_v48  ;;  %683 = vmatpush.msrb.mxu1 %v607_v49  ;;  %v745_v49 = vld [vmem:[#allocation11 + $0x1] ss:$0 sm:$0xff] }
 0x155   :  { %623 = vmatpush.msra.mxu2 %v559_v58  ;;  %643 = vmatpush.msra.mxu3 %v575_v59 }
 0x156   :  { %664 = vmatpush.msrb.mxu0 %v590_v52  ;;  %684 = vmatpush.msrb.mxu1 %v606_v53 }
 0x157   :  { %624 = vmatpush.msra.mxu2 %v558_v62  ;;  %644 = vmatpush.msra.mxu3 %v574_v63 }
 0x158   :  { %665 = vmatpush.msrb.mxu0 %v589_v56  ;;  %685 = vmatpush.msrb.mxu1 %v605_v57 }
 0x159   :  { %625 = vmatpush.msra.mxu2 %v557_v2  ;;  %645 = vmatpush.msra.mxu3 %v573_v3 }
 0x15a   :  { %666 = vmatpush.msrb.mxu0 %v588_v60  ;;  %686 = vmatpush.msrb.mxu1 %v604_v61 }
 0x15b   :  { %626 = vmatpush.msra.mxu2 %v556_v6  ;;  %646 = vmatpush.msra.mxu3 %v572_v7 }
 0x15c   :  { %667 = vmatpush.msrb.mxu0 %v587_v0  ;;  %687 = vmatpush.msrb.mxu1 %v603_v1 }
 0x15d   :  { %627 = vmatpush.msra.mxu2 %v555_v10  ;;  %647 = vmatpush.msra.mxu3 %v571_v11 }
 0x15e   :  { %668 = vmatpush.msrb.mxu0 %v586_v4  ;;  %688 = vmatpush.msrb.mxu1 %v602_v5 }
 0x15f   :  { %628 = vmatpush.msra.mxu2 %v554_v14  ;;  %648 = vmatpush.msra.mxu3 %v570_v15 }
 0x160   :  { %669 = vmatpush.msrb.mxu0 %v585_v8  ;;  %689 = vmatpush.msrb.mxu1 %v601_v9 }
 0x161   :  { %629 = vmatpush.msra.mxu2 %v553_v18  ;;  %649 = vmatpush.msra.mxu3 %v569_v19 }
 0x162   :  { %670 = vmatpush.msrb.mxu0 %v584_v12  ;;  %690 = vmatpush.msrb.mxu1 %v600_v13 }
 0x163   :  { %630 = vmatpush.msra.mxu2 %v552_v20  ;;  %650 = vmatpush.msra.mxu3 %v568_v21 }
 0x164   :  { %671 = vmatpush.msrb.mxu0 %v583_v16  ;;  %691 = vmatpush.msrb.mxu1 %v599_v17 }
 0x165   :  { %631 = vmatpush.msra.mxu2 %v551_v22  ;;  %651 = vmatpush.msra.mxu3 %v567_v23 }
 0x1c0   :  { %v427_v24 = vpop.f32.mrf.mxu0  ;;  %v447_v25 = vpop.f32.mrf.mxu1 }
 0x1c5   :  { %v387_v27 = vpop.f32.mrf.mxu2  ;;  %v407_v28 = vpop.f32.mrf.mxu3 }
 0x1c8   :  { %v511_v31 = vpop.f32.mrf.mxu0  ;;  %v531_v32 = vpop.f32.mrf.mxu1 }
 0x1c9   :  { %v512_v33 = vadd.f32 %v511_v31, %v427_v24  ;;  %v532_v34 = vadd.f32 %v531_v32, %v447_v25 }
 0x1cb   :  { %v545_v35 = vadd.f32 %v537_v29, %v512_v33  ;;  %v546_v36 = vadd.f32 %v538_v30, %v532_v34 }
 0x1cd   :  { %v549_v39 = vmax.f32 %v545_v35, 0.0  ;;  %v550_v40 = vmax.f32 %v546_v36, 0.0  ;;  %v471_v41 = vpop.f32.mrf.mxu2  ;;  %v491_v42 = vpop.f32.mrf.mxu3 }
 0x1ce   :  { %v472_v43 = vadd.f32 %v471_v41, %v387_v27  ;;  %v492_v44 = vadd.f32 %v491_v42, %v407_v28 }
 0x1cf   :  { %672 = vmatmul.f32.vlgmr.msrb.gmra.mxu0 %v549_v39  ;;  %692 = vmatmul.f32.vlgmr.msrb.gmra.mxu1 %v550_v40 }
 0x1d0   :  { %v543_v45 = vadd.f32 %v535_v37, %v472_v43  ;;  %v544_v46 = vadd.f32 %v536_v38, %v492_v44 }
 0x1d2   :  { %v547_v47 = vmax.f32 %v543_v45, 0.0  ;;  %v548_v48 = vmax.f32 %v544_v46, 0.0 }
 0x1d4   :  { %632 = vmatmul.f32.vlgmr.msra.gmra.mxu2 %v547_v47  ;;  %652 = vmatmul.f32.vlgmr.msra.gmra.mxu3 %v548_v48 }
 0x24c   :  { %v673_v54 = vpop.f32.mrf.mxu0  ;;  %v693_v56 = vpop.f32.mrf.mxu1 }
 0x257   :  { %v633_v50 = vpop.f32.mrf.mxu2  ;;  %v653_v52 = vpop.f32.mrf.mxu3 }
 0x258   :  { %v634_v51 = vadd.f32 %v745_v49, %v633_v50 }
 0x25a   :  { %v654_v53 = vadd.f32 %v653_v52, %v634_v51 }
 0x25c   :  { %v674_v55 = vadd.f32 %v673_v54, %v654_v53 }
 0x25e   :  { %v694_v57 = vadd.f32 %v693_v56, %v674_v55 }
 0x260   :  { %696 = vst [vmem:[#allocation13] sm:$0x3] %v694_v57 }
 0x261   :  { %707 = dma.vmem_to_hbm [thread:$0]  %s703_s23, 32, %s705_s26, [#allocation4]  }
 0x262   :  { %930 = dma.done.wait [#allocation4], 32  }
 0x263   :  { %931 = vsyncadd [#allocation4], 4294967264 }
 0x264   :  { %712 = vsyncpa [#allocation3], 1 }
 0x265   :  { %713 = vsyncpa [#allocation6], 1 }
 0x266   :  { %714 = vsyncpa [#allocation9], 1 }
 0x267   :  { %715 = vsyncpa [#allocation12], 1 }
 0x268   :  { %716 = vsyncpa [#allocation4], 1 }

</bundles_post_ra>
